<compile_context>
chip_gen: v7x
topology: tpu7x:2x2x1
jax: 0.10.0
libtpu: 0.0.40
codegen_flags: <defaults>
</compile_context>

<pallas_src>
import functools

import jax
import jax.numpy as jnp
from jax.experimental import pallas as pl
from jax.experimental.pallas import tpu as pltpu


HIDDEN1 = 381           # logical sizes (match the PyTorch module)
HIDDEN2 = 70
HIDDEN1_PAD = 384       # padded to multiples of the 128-lane vreg width
HIDDEN2_PAD = 128


def _round_up(n, m):
    return ((n + m - 1) // m) * m


def _actor_kernel(x_ref, w1_ref, b1_ref, w2_ref, b2_ref, w3_ref, b3_ref, o_ref):
    x = x_ref[...]

    h1 = jnp.dot(x, w1_ref[...], preferred_element_type=jnp.float32) + b1_ref[...]
    h1 = jnp.maximum(h1, 0.0)

    h2 = jnp.dot(h1, w2_ref[...], preferred_element_type=jnp.float32) + b2_ref[...]
    h2 = jnp.maximum(h2, 0.0)

    logits = jnp.dot(h2, w3_ref[...], preferred_element_type=jnp.float32) + b3_ref[...]

    # Numerically-stable softmax over the action dimension (axis=1).
    m = jnp.max(logits, axis=1, keepdims=True)
    e = jnp.exp(logits - m)
    s = jnp.sum(e, axis=1, keepdims=True)
    o_ref[...] = (e * pl.reciprocal(s)).astype(o_ref.dtype)


@functools.partial(jax.jit, static_argnames=("block_batch",))
def maddpg_actor_forward(x, params, *, block_batch=128):
    """x: (batch, obs_size) float32.  params: padded, transposed weights."""
    w1, b1, w2, b2, w3, b3 = (
        params["w1"], params["b1"], params["w2"],
        params["b2"], params["w3"], params["b3"],
    )
    batch, obs = x.shape
    n_actions = w3.shape[1]

    # Batch tile: at least 8 (sublane granularity), at most block_batch.
    # Pad the batch so it divides evenly; padded rows compute throwaway values
    # that are sliced off below.
    tb = min(block_batch, _round_up(batch, 8))
    padded_batch = _round_up(batch, tb)
    if padded_batch != batch:
        x = jnp.pad(x, ((0, padded_batch - batch), (0, 0)))

    resident = lambda shape: pl.BlockSpec(shape, lambda i: (0, 0))

    out = pl.pallas_call(
        _actor_kernel,
        out_shape=jax.ShapeDtypeStruct((padded_batch, n_actions), jnp.float32),
        grid=(padded_batch // tb,),
        in_specs=[
            pl.BlockSpec((tb, obs), lambda i: (i, 0)),      # batch-tiled input
            resident(w1.shape), resident(b1.shape),         # weights stay in VMEM
            resident(w2.shape), resident(b2.shape),
            resident(w3.shape), resident(b3.shape),
        ],
        out_specs=pl.BlockSpec((tb, n_actions), lambda i: (i, 0)),
        compiler_params=pltpu.CompilerParams(
            dimension_semantics=("parallel",)),
    )(x, w1, b1, w2, b2, w3, b3)

    return out[:batch]


def init_params(key, obs_size, n_actions):
    """PyTorch-Linear-style U(-1/sqrt(fan_in), 1/sqrt(fan_in)) init.

    Returns (padded_params, logical_params).  Padded weights are transposed to
    (in_features, out_features) and zero-padded so hidden dims are 128-lane
    multiples; the padding does not change the forward-pass math.
    """
    def linear(k, fan_in, fan_out):
        kw, kb = jax.random.split(k)
        bound = 1.0 / jnp.sqrt(fan_in)
        w = jax.random.uniform(kw, (fan_in, fan_out), jnp.float32, -bound, bound)
        b = jax.random.uniform(kb, (1, fan_out), jnp.float32, -bound, bound)
        return w, b

    k1, k2, k3 = jax.random.split(key, 3)
    w1, b1 = linear(k1, obs_size, HIDDEN1)
    w2, b2 = linear(k2, HIDDEN1, HIDDEN2)
    w3, b3 = linear(k3, HIDDEN2, n_actions)
    logical = {"w1": w1, "b1": b1, "w2": w2, "b2": b2, "w3": w3, "b3": b3}

    pad1 = HIDDEN1_PAD - HIDDEN1
    pad2 = HIDDEN2_PAD - HIDDEN2
    padded = {
        "w1": jnp.pad(w1, ((0, 0), (0, pad1))),
        "b1": jnp.pad(b1, ((0, 0), (0, pad1))),
        "w2": jnp.pad(w2, ((0, pad1), (0, pad2))),
        "b2": jnp.pad(b2, ((0, 0), (0, pad2))),
        "w3": jnp.pad(w3, ((0, pad2), (0, 0))),
        "b3": b3,
    }
    return padded, logical


def _reference(x, p):
    # Pure-JAX reference on the UNPADDED logical weights (also verifies that
    # the zero-padding in the kernel path is a numerical no-op).
    h1 = jnp.maximum(x @ p["w1"] + p["b1"], 0.0)
    h2 = jnp.maximum(h1 @ p["w2"] + p["b2"], 0.0)
    logits = h2 @ p["w3"] + p["b3"]
    return jax.nn.softmax(logits, axis=1)


if __name__ == "__main__":
    batch, obs_size, n_actions = 8, 16, 8

    key = jax.random.PRNGKey(0)
    kx, kp = jax.random.split(key)
    x = jax.random.normal(kx, (batch, obs_size), dtype=jnp.float32)
    params, logical_params = init_params(kp, obs_size, n_actions)

    out = jax.block_until_ready(maddpg_actor_forward(x, params))
    ref = _reference(x, logical_params)

    assert out.shape == (batch, n_actions)
    assert jnp.allclose(out, ref, atol=1e-5, rtol=1e-5)
    # rows of a softmax sum to 1
    assert jnp.allclose(jnp.sum(out, axis=1), jnp.ones((batch,)), atol=1e-5)

    print("KERNEL_OK")
</pallas_src>

<mosaic_0001>
module attributes {stable_mosaic.version = 11 : i64} {
  func.func @_actor_kernel(%arg0: i32, %arg1: memref<8x16xf32, #tpu.memory_space<vmem>>, %arg2: memref<16x384xf32, #tpu.memory_space<vmem>>, %arg3: memref<1x384xf32, #tpu.memory_space<vmem>>, %arg4: memref<384x128xf32, #tpu.memory_space<vmem>>, %arg5: memref<1x128xf32, #tpu.memory_space<vmem>>, %arg6: memref<128x8xf32, #tpu.memory_space<vmem>>, %arg7: memref<1x8xf32, #tpu.memory_space<vmem>>, %arg8: memref<8x8xf32, #tpu.memory_space<vmem>>) attributes {dimension_semantics = [#tpu.dimension_semantics<parallel>], iteration_bounds = array<i64: 1>, scalar_prefetch = 0 : i64, scratch_operands = 0 : i64, tpu.core_type = #tpu.core_type<tc>, window_params = [{transform_indices = @transform_0, window_bounds = array<i64: 8, 16>}, {pipeline_mode = #tpu.pipeline_mode<synchronous>, transform_indices = @transform_1, window_bounds = array<i64: 16, 384>}, {pipeline_mode = #tpu.pipeline_mode<synchronous>, transform_indices = @transform_2, window_bounds = array<i64: 1, 384>}, {pipeline_mode = #tpu.pipeline_mode<synchronous>, transform_indices = @transform_3, window_bounds = array<i64: 384, 128>}, {pipeline_mode = #tpu.pipeline_mode<synchronous>, transform_indices = @transform_4, window_bounds = array<i64: 1, 128>}, {pipeline_mode = #tpu.pipeline_mode<synchronous>, transform_indices = @transform_5, window_bounds = array<i64: 128, 8>}, {pipeline_mode = #tpu.pipeline_mode<synchronous>, transform_indices = @transform_6, window_bounds = array<i64: 1, 8>}, {transform_indices = @transform_7, window_bounds = array<i64: 8, 8>}]} {
    %c0 = arith.constant 0 : index
    %c0_0 = arith.constant 0 : index
    %0 = vector.load %arg1[%c0, %c0_0] : memref<8x16xf32, #tpu.memory_space<vmem>>, vector<8x16xf32>
    %c0_1 = arith.constant 0 : index
    %c0_2 = arith.constant 0 : index
    %1 = vector.load %arg2[%c0_1, %c0_2] : memref<16x384xf32, #tpu.memory_space<vmem>>, vector<16x384xf32>
    %cst = arith.constant dense<0.000000e+00> : vector<8x384xf32>
    %2 = tpu.matmul %0, %1, %cst {dimension_numbers = #tpu.dot_dimension_numbers<[1], [0], [0], [1], [0, 0, 1, 1], [], []>} : vector<8x16xf32>, vector<16x384xf32>, vector<8x384xf32> -> vector<8x384xf32>
    %c0_3 = arith.constant 0 : index
    %c0_4 = arith.constant 0 : index
    %3 = vector.load %arg3[%c0_3, %c0_4] : memref<1x384xf32, #tpu.memory_space<vmem>>, vector<1x384xf32>
    %4 = vector.broadcast %3 : vector<1x384xf32> to vector<8x384xf32>
    %5 = arith.addf %2, %4 : vector<8x384xf32>
    %cst_5 = arith.constant 0.000000e+00 : f32
    %6 = vector.broadcast %cst_5 : f32 to vector<8x384xf32>
    %7 = arith.maximumf %5, %6 : vector<8x384xf32>
    %c0_6 = arith.constant 0 : index
    %c0_7 = arith.constant 0 : index
    %8 = vector.load %arg4[%c0_6, %c0_7] : memref<384x128xf32, #tpu.memory_space<vmem>>, vector<384x128xf32>
    %cst_8 = arith.constant dense<0.000000e+00> : vector<8x128xf32>
    %9 = tpu.matmul %7, %8, %cst_8 {dimension_numbers = #tpu.dot_dimension_numbers<[1], [0], [0], [1], [0, 0, 1, 1], [], []>} : vector<8x384xf32>, vector<384x128xf32>, vector<8x128xf32> -> vector<8x128xf32>
    %c0_9 = arith.constant 0 : index
    %c0_10 = arith.constant 0 : index
    %10 = vector.load %arg5[%c0_9, %c0_10] : memref<1x128xf32, #tpu.memory_space<vmem>>, vector<1x128xf32>
    %11 = vector.broadcast %10 : vector<1x128xf32> to vector<8x128xf32>
    %12 = arith.addf %9, %11 : vector<8x128xf32>
    %cst_11 = arith.constant 0.000000e+00 : f32
    %13 = vector.broadcast %cst_11 : f32 to vector<8x128xf32>
    %14 = arith.maximumf %12, %13 : vector<8x128xf32>
    %c0_12 = arith.constant 0 : index
    %c0_13 = arith.constant 0 : index
    %15 = vector.load %arg6[%c0_12, %c0_13] : memref<128x8xf32, #tpu.memory_space<vmem>>, vector<128x8xf32>
    %cst_14 = arith.constant dense<0.000000e+00> : vector<8x8xf32>
    %16 = tpu.matmul %14, %15, %cst_14 {dimension_numbers = #tpu.dot_dimension_numbers<[1], [0], [0], [1], [0, 0, 1, 1], [], []>} : vector<8x128xf32>, vector<128x8xf32>, vector<8x8xf32> -> vector<8x8xf32>
    %c0_15 = arith.constant 0 : index
    %c0_16 = arith.constant 0 : index
    %17 = vector.load %arg7[%c0_15, %c0_16] : memref<1x8xf32, #tpu.memory_space<vmem>>, vector<1x8xf32>
    %18 = vector.broadcast %17 : vector<1x8xf32> to vector<8x8xf32>
    %19 = arith.addf %16, %18 : vector<8x8xf32>
    %cst_17 = arith.constant dense<0xFF800000> : vector<8xf32>
    %20 = vector.multi_reduction <maximumf>, %19, %cst_17 [1] : vector<8x8xf32> to vector<8xf32>
    %21 = vector.shape_cast %20 : vector<8xf32> to vector<8x1xf32>
    %22 = vector.broadcast %21 : vector<8x1xf32> to vector<8x8xf32>
    %23 = arith.subf %19, %22 : vector<8x8xf32>
    %24 = math.exp %23 : vector<8x8xf32>
    %cst_18 = arith.constant dense<0.000000e+00> : vector<8xf32>
    %25 = vector.multi_reduction <add>, %24, %cst_18 [1] : vector<8x8xf32> to vector<8xf32>
    %26 = vector.shape_cast %25 : vector<8xf32> to vector<8x1xf32>
    %27 = tpu.reciprocal %26 : vector<8x1xf32> -> vector<8x1xf32>
    %28 = vector.broadcast %27 : vector<8x1xf32> to vector<8x8xf32>
    %29 = arith.mulf %24, %28 : vector<8x8xf32>
    %c0_19 = arith.constant 0 : index
    %c0_20 = arith.constant 0 : index
    %30 = vector.load %arg8[%c0_19, %c0_20] : memref<8x8xf32, #tpu.memory_space<vmem>>, vector<8x8xf32>
    tpu.vector_store %arg8[%c0_19, %c0_20], %29 {strides = array<i32>} : memref<8x8xf32, #tpu.memory_space<vmem>>, vector<8x8xf32>,
    return
  }
  func.func @transform_0(%arg0: i32) -> (i32, i32) {
    %c0_i32 = arith.constant 0 : i32
    %c0_i32_0 = arith.constant 0 : i32
    return %arg0, %c0_i32 : i32, i32
  }
  func.func @transform_1(%arg0: i32) -> (i32, i32) {
    %c0_i32 = arith.constant 0 : i32
    %c0_i32_0 = arith.constant 0 : i32
    %c0_i32_1 = arith.constant 0 : i32
    return %c0_i32, %c0_i32_0 : i32, i32
  }
  func.func @transform_2(%arg0: i32) -> (i32, i32) {
    %c0_i32 = arith.constant 0 : i32
    %c0_i32_0 = arith.constant 0 : i32
    %c0_i32_1 = arith.constant 0 : i32
    return %c0_i32, %c0_i32_0 : i32, i32
  }
  func.func @transform_3(%arg0: i32) -> (i32, i32) {
    %c0_i32 = arith.constant 0 : i32
    %c0_i32_0 = arith.constant 0 : i32
    %c0_i32_1 = arith.constant 0 : i32
    return %c0_i32, %c0_i32_0 : i32, i32
  }
  func.func @transform_4(%arg0: i32) -> (i32, i32) {
    %c0_i32 = arith.constant 0 : i32
    %c0_i32_0 = arith.constant 0 : i32
    %c0_i32_1 = arith.constant 0 : i32
    return %c0_i32, %c0_i32_0 : i32, i32
  }
  func.func @transform_5(%arg0: i32) -> (i32, i32) {
    %c0_i32 = arith.constant 0 : i32
    %c0_i32_0 = arith.constant 0 : i32
    %c0_i32_1 = arith.constant 0 : i32
    return %c0_i32, %c0_i32_0 : i32, i32
  }
  func.func @transform_6(%arg0: i32) -> (i32, i32) {
    %c0_i32 = arith.constant 0 : i32
    %c0_i32_0 = arith.constant 0 : i32
    %c0_i32_1 = arith.constant 0 : i32
    return %c0_i32, %c0_i32_0 : i32, i32
  }
  func.func @transform_7(%arg0: i32) -> (i32, i32) {
    %c0_i32 = arith.constant 0 : i32
    %c0_i32_0 = arith.constant 0 : i32
    return %arg0, %c0_i32 : i32, i32
  }
}

</mosaic_0001>

<bundles_post_ra>
// kernel: maddpg_actor_forward.1
= control target key start
LH: loop header
LB: loop body
LE: loop exit
PB: predicated region body
PF: predicated region fallthrough
CT: control target
= control target key end

     0   :  { %12 = vsyncpa [#allocation3], 0  ;;  %s1007_s0 = inlined_call_operand.vmem [shape: f32[8,16], index: 0, kind: input, shape index: {}]   ;;  %s1008_s1 = inlined_call_operand.vmem [shape: f32[16,384], index: 1, kind: input, shape index: {}]   ;;  %s1009_s2 = inlined_call_operand.vmem [shape: f32[1,384], index: 2, kind: input, shape index: {}]   ;;  %s1010_s3 = inlined_call_operand.hbm [shape: f32[384,128], index: 3, kind: input, shape index: {}]   ;;  %s1011_s4 = inlined_call_operand.vmem [shape: f32[1,128], index: 4, kind: input, shape index: {}]   ;;  %s1012_s5 = inlined_call_operand.vmem [shape: f32[128,8], index: 5, kind: input, shape index: {}]   ;;  %s1013_s6 = inlined_call_operand.vmem [shape: f32[1,8], index: 6, kind: input, shape index: {}]   ;;  %s1014_s7 = inlined_call_operand.hbm [shape: f32[8,8], index: 7, kind: output, shape index: {}]  }
   0x1   :  { %13 = vsyncpa [#allocation4], 0  ;;  %s829_s24 = smov [#allocation2]   ;;  %s781_s28 = scalar_lea.hbm %s1010_s3, 6144 }
   0x2   :  { %s25_s25 = sshll.u32 %s829_s24, 4  ;;  %p782_p0 = scmp.ne.s32.totalorder %s1010_s3, %s781_s28  ;;  %s26_s25 = int_to_ptr.vmem [resolvable:$true] %s25_s25 }
   0x3   :  { %p785_p1 = scmp.lt.u32.totalorder %s781_s28, %s1010_s3 }
   0x5   :  { %p787_p2 = pnand %p785_p1, %p782_p0 }
   0x7   :  { %790 = shalt.err (!%p787_p2)
}
   0x8   :  { %s791_s10 = scalar_lea.vmem %s26_s25, 6144  ;;  %p796_p4 = scmp.lt.s32.totalorder %s26_s25, %s26_s25 }
   0x9   :  { %p792_p3 = scmp.ne.s32.totalorder %s26_s25, %s791_s10  ;;  %p797_p5 = scmp.lt.s32.totalorder %s791_s10, %s791_s10 }
   0xb   :  { %p798_p6 = por %p797_p5, %p796_p4 }
   0xd   :  { %p799_p7 = pnand %p798_p6, %p792_p3 }
   0xf   :  { %802 = shalt.err (!%p799_p7)
}
  0x10   :  { %s830_s11 = smov 128   ;;  %s831_s12 = smov 8  }
  0x11   :  { %31 = dma.hbm_to_vmem [thread:$0]  %s1010_s3, 6144, %s26_s25, [#allocation3], %s830_s11, %s830_s11, %s831_s12  }
  0x12   :  { %825 = dma.done.wait [#allocation3], 6144  }
  0x13   :  { %826 = vsyncadd [#allocation3], 4294961152  ;;  %v832_v0 = vmov 0.0   ;;  %v43_v1 = vld [vmem:[%s1008_s1 + $0x8] sm:$0xff]  ;;  %v46_v2 = vld [vmem:[%s1008_s1 + $0x20] sm:$0xff]  ;;  %vm65_vm0 = vcmask 130048  }
  0x14   :  { %133 = vmatprep.mubr.f32.mxu1 %v832_v0  ;;  %v42_v3 = vld [vmem:[%s1008_s1] sm:$0xff]  ;;  %v683_v4 = vpack.c.bf16 %v46_v2, %v43_v1  ;;  %v45_v5 = vld [vmem:[%s1008_s1 + $0x18] sm:$0xff]  ;;  %v44_v6 = vld [vmem:[%s1008_s1 + $0x10] sm:$0xff]  ;;  %v833_v21 = vmov 0.0|0.0   ;;  %vm834_vm1 = vmmov 0   ;;  %vm502_vm2 = vcmask 64512  }
  0x15   :  { %v685_v7 = vpack.c.bf16 %v45_v5, %v42_v3  ;;  %v41_v8 = vld [vmem:[%s1007_s0] sm:$0xff]  ;;  %v47_v9 = vld [vmem:[%s1008_s1 + $0x28] sm:$0xff]  ;;  %v231_v15 = vld [vmem:[#allocation2 + $0x90] sm:$0xff] }
  0x16   :  { %v229_v10 = vld [vmem:[#allocation2 + $0x80] sm:$0xff]  ;;  %v230_v11 = vld [vmem:[#allocation2 + $0x88] sm:$0xff]  ;;  %684 = vmatprep.subr.bf16.mxu1 %v683_v4  ;;  %v688_v16 = vpack.c.bf16 %v47_v9, %v44_v6  ;;  %v232_v18 = vld [vmem:[#allocation2 + $0x98] sm:$0xff] }
  0x17   :  { %v690_v12 = vpack.c.bf16 %v230_v11, %v229_v10  ;;  %v213_v13 = vld [vmem:[#allocation2] sm:$0xff]  ;;  %v214_v14 = vld [vmem:[#allocation2 + $0x8] sm:$0xff]  ;;  %686 = vmatpush1.bf16.msra.mxu1 %v685_v7  ;;  %v215_v19 = vld [vmem:[#allocation2 + $0x10] sm:$0xff]  ;;  %v694_v22 = vpack.c.bf16 %v232_v18, %v231_v15 }
  0x18   :  { %v692_v17 = vpack.c.bf16 %v214_v14, %v213_v13  ;;  %v216_v20 = vld [vmem:[#allocation2 + $0x18] sm:$0xff]  ;;  %687 = vmatprep.subr.bf16.mxu1 %v833_v21  ;;  %v245_v23 = vld [vmem:[#allocation2 + $0x100] sm:$0xff]  ;;  %v246_v24 = vld [vmem:[#allocation2 + $0x108] sm:$0xff] }
  0x19   :  { %691 = vmatprep.subr.bf16.mxu0 %v690_v12  ;;  %v233_v25 = vld [vmem:[#allocation2 + $0xa0] sm:$0xff]  ;;  %v696_v26 = vpack.c.bf16 %v216_v20, %v215_v19  ;;  %v234_v27 = vld [vmem:[#allocation2 + $0xa8] sm:$0xff]  ;;  %v723_v31 = vpack.c.bf16 %v246_v24, %v245_v23  ;;  %v235_v32 = vld [vmem:[#allocation2 + $0xb0] sm:$0xff] }
  0x1a   :  { %693 = vmatpush3.bf16.msra.mxu0 %v692_v17  ;;  %530 = vmatmul.mubr.msk.f32.vlgmr.msra.gmra.mrb[0].mxu1 %vm65_vm0, %v41_v8  ;;  %v698_v28 = vpack.c.bf16 %v234_v27, %v233_v25  ;;  %v217_v29 = vld [vmem:[#allocation2 + $0x20] sm:$0xff]  ;;  %v218_v30 = vld [vmem:[#allocation2 + $0x28] sm:$0xff]  ;;  %v236_v33 = vld [vmem:[#allocation2 + $0xb8] sm:$0xff] }
  0x1b   :  { %695 = vmatprep.subr.bf16.mxu0 %v694_v22  ;;  %689 = vmatpush3.bf16.msra.mxu1 %v688_v16  ;;  %v247_v34 = vld [vmem:[#allocation2 + $0x110] sm:$0xff]  ;;  %v248_v35 = vld [vmem:[#allocation2 + $0x118] sm:$0xff]  ;;  %v700_v36 = vpack.c.bf16 %v218_v30, %v217_v29  ;;  %v702_v37 = vpack.c.bf16 %v236_v33, %v235_v32  ;;  %v237_v41 = vld [vmem:[#allocation2 + $0xc0] sm:$0xff]  ;;  %v50_v22 = vlaneseq }
  0x1c   :  { %610 = vmatprep.mubr.msk.f32.mxu1 %vm834_vm1, %v832_v0  ;;  %722 = vmatprep.subr.bf16.mxu1 %v833_v21  ;;  %v219_v38 = vld [vmem:[#allocation2 + $0x30] sm:$0xff]  ;;  %v220_v39 = vld [vmem:[#allocation2 + $0x38] sm:$0xff]  ;;  %v726_v40 = vpack.c.bf16 %v248_v35, %v247_v34  ;;  %v238_v42 = vld [vmem:[#allocation2 + $0xc8] sm:$0xff] }
  0x1d   :  { %v249_v43 = vld [vmem:[#allocation2 + $0x120] sm:$0xff]  ;;  %v250_v44 = vld [vmem:[#allocation2 + $0x128] sm:$0xff]  ;;  %v704_v45 = vpack.c.bf16 %v220_v39, %v219_v38  ;;  %v706_v46 = vpack.c.bf16 %v238_v42, %v237_v41  ;;  %v239_v50 = vld [vmem:[#allocation2 + $0xd0] sm:$0xff]  ;;  %v51_v23 = vshrl.u32 %v50_v22, 7 }
  0x1e   :  { %697 = vmatpush3.bf16.msra.mxu0 %v696_v26  ;;  %611 = vmatmul.mubr.msk.f32.vlgmr.msra.gmra.mrb[2].mxu1 %vm65_vm0, %v41_v8  ;;  %v221_v47 = vld [vmem:[#allocation2 + $0x40] sm:$0xff]  ;;  %v222_v48 = vld [vmem:[#allocation2 + $0x48] sm:$0xff]  ;;  %v729_v49 = vpack.c.bf16 %v250_v44, %v249_v43  ;;  %v240_v51 = vld [vmem:[#allocation2 + $0xd8] sm:$0xff] }
  0x1f   :  { %699 = vmatprep.subr.bf16.mxu0 %v698_v28  ;;  %724 = vmatpush3.bf16.msra.mxu1 %v723_v31  ;;  %v251_v52 = vld [vmem:[#allocation2 + $0x130] sm:$0xff]  ;;  %v252_v53 = vld [vmem:[#allocation2 + $0x138] sm:$0xff]  ;;  %v708_v54 = vpack.c.bf16 %v222_v48, %v221_v47  ;;  %v710_v55 = vpack.c.bf16 %v240_v51, %v239_v50  ;;  %v241_v59 = vld [vmem:[#allocation2 + $0xe0] sm:$0xff]  ;;  %v52_v24 = vsub.s32 0, %v51_v23  ;;  %v56_v26 = vsub.s32 1, %v51_v23 }
  0x20   :  { %645 = vmatprep.mubr.msk.f32.mxu1 %vm834_vm1, %v832_v0  ;;  %725 = vmatprep.subr.bf16.mxu1 %v833_v21  ;;  %v223_v56 = vld [vmem:[#allocation2 + $0x50] sm:$0xff]  ;;  %v224_v57 = vld [vmem:[#allocation2 + $0x58] sm:$0xff]  ;;  %v732_v58 = vpack.c.bf16 %v252_v53, %v251_v52  ;;  %v242_v60 = vld [vmem:[#allocation2 + $0xe8] sm:$0xff]  ;;  %v60_v28 = vsub.s32 2, %v51_v23 }
  0x21   :  { %v253_v61 = vld [vmem:[#allocation2 + $0x140] sm:$0xff]  ;;  %v254_v62 = vld [vmem:[#allocation2 + $0x148] sm:$0xff]  ;;  %v712_v63 = vpack.c.bf16 %v224_v57, %v223_v56  ;;  %v714_v1 = vpack.c.bf16 %v242_v60, %v241_v59  ;;  %v255_v5 = vld [vmem:[#allocation2 + $0x150] sm:$0xff] }
  0x22   :  { %701 = vmatpush3.bf16.msra.mxu0 %v700_v36  ;;  %v735_v2 = vpack.c.bf16 %v254_v62, %v253_v61  ;;  %v225_v3 = vld [vmem:[#allocation2 + $0x60] sm:$0xff]  ;;  %v226_v4 = vld [vmem:[#allocation2 + $0x68] sm:$0xff]  ;;  %v256_v7 = vld [vmem:[#allocation2 + $0x158] sm:$0xff] }
  0x23   :  { %703 = vmatprep.subr.bf16.mxu0 %v702_v37  ;;  %727 = vmatpush3.bf16.msra.mxu1 %v726_v40  ;;  %v716_v6 = vpack.c.bf16 %v226_v4, %v225_v3  ;;  %v738_v8 = vpack.c.bf16 %v256_v7, %v255_v5  ;;  %v243_v9 = vld [vmem:[#allocation2 + $0xf0] sm:$0xff]  ;;  %v244_v10 = vld [vmem:[#allocation2 + $0xf8] sm:$0xff]  ;;  %v257_v14 = vld [vmem:[#allocation2 + $0x160] sm:$0xff] }
  0x24   :  { %728 = vmatprep.subr.bf16.mxu1 %v833_v21  ;;  %v718_v11 = vpack.c.bf16 %v244_v10, %v243_v9  ;;  %v227_v12 = vld [vmem:[#allocation2 + $0x70] sm:$0xff]  ;;  %v228_v13 = vld [vmem:[#allocation2 + $0x78] sm:$0xff]  ;;  %v258_v16 = vld [vmem:[#allocation2 + $0x168] sm:$0xff] }
  0x25   :  { %v720_v15 = vpack.c.bf16 %v228_v13, %v227_v12  ;;  %v741_v17 = vpack.c.bf16 %v258_v16, %v257_v14  ;;  %v259_v18 = vld [vmem:[#allocation2 + $0x170] sm:$0xff]  ;;  %v260_v19 = vld [vmem:[#allocation2 + $0x178] sm:$0xff]  ;;  %v48_v25 = vld [vmem:[%s1009_s2] sm:$0x7] }
  0x26   :  { %705 = vmatpush3.bf16.msra.mxu0 %v704_v45  ;;  %v744_v20 = vpack.c.bf16 %v260_v19, %v259_v18  ;;  %v53_v27 = vrot.slane %v48_v25, %v52_v24  ;;  %v57_v29 = vrot.slane %v48_v25, %v56_v26  ;;  %v61_v33 = vrot.slane %v48_v25, %v60_v28  ;;  %v409_v34 = vld [vmem:[%s1012_s5] sm:$0xff]  ;;  %v410_v35 = vld [vmem:[%s1012_s5 + $0x8] sm:$0xff]  ;;  %v411_v43 = vld [vmem:[%s1012_s5 + $0x10] sm:$0xff] }
  0x27   :  { %707 = vmatprep.subr.bf16.mxu0 %v706_v46  ;;  %730 = vmatpush3.bf16.msra.mxu1 %v729_v49  ;;  %v747_v39 = vpack.c.bf16 %v410_v35, %v409_v34  ;;  %v412_v44 = vld [vmem:[%s1012_s5 + $0x18] sm:$0xff]  ;;  %v413_v47 = vld [vmem:[%s1012_s5 + $0x20] sm:$0xff]  ;;  %v414_v48 = vld [vmem:[%s1012_s5 + $0x28] sm:$0xff] }
  0x28   :  { %731 = vmatprep.subr.bf16.mxu1 %v833_v21  ;;  %v750_v46 = vpack.c.bf16 %v412_v44, %v411_v43  ;;  %v753_v49 = vpack.c.bf16 %v414_v48, %v413_v47  ;;  %v415_v50 = vld [vmem:[%s1012_s5 + $0x30] sm:$0xff]  ;;  %v417_v52 = vld [vmem:[%s1012_s5 + $0x40] sm:$0xff]  ;;  %v418_v53 = vld [vmem:[%s1012_s5 + $0x48] sm:$0xff] }
  0x29   :  { %v420_v56 = vld [vmem:[%s1012_s5 + $0x58] sm:$0xff]  ;;  %v422_v59 = vld [vmem:[%s1012_s5 + $0x68] sm:$0xff]  ;;  %v423_v61 = vld [vmem:[%s1012_s5 + $0x70] sm:$0xff] }
  0x2a   :  { %709 = vmatpush3.bf16.msra.mxu0 %v708_v54  ;;  %v759_v54 = vpack.c.bf16 %v418_v53, %v417_v52  ;;  %v424_v62 = vld [vmem:[%s1012_s5 + $0x78] sm:$0xff]  ;;  %v532_v3 = vld [vmem:[%s1011_s4] ss:$0 sm:$0xff]  ;;  %s835_s4 = smov [#allocation5]  }
  0x2b   :  { %711 = vmatprep.subr.bf16.mxu0 %v710_v55  ;;  %733 = vmatpush3.bf16.msra.mxu1 %v732_v58  ;;  %v419_v55 = vld [vmem:[%s1012_s5 + $0x50] sm:$0xff]  ;;  %v421_v58 = vld [vmem:[%s1012_s5 + $0x60] sm:$0xff] }
  0x2c   :  { %734 = vmatprep.subr.bf16.mxu1 %v833_v21  ;;  %v762_v57 = vpack.c.bf16 %v420_v56, %v419_v55  ;;  %v765_v60 = vpack.c.bf16 %v422_v59, %v421_v58  ;;  %v533_v9 = vld [vmem:[%s1013_s6] ss:$0 sm:$0xff] }
  0x2e   :  { %713 = vmatpush3.bf16.msra.mxu0 %v712_v63  ;;  %v768_v63 = vpack.c.bf16 %v424_v62, %v423_v61 }
  0x2f   :  { %715 = vmatprep.subr.bf16.mxu0 %v714_v1  ;;  %736 = vmatpush3.bf16.msra.mxu1 %v735_v2 }
  0x30   :  { %737 = vmatprep.subr.bf16.mxu1 %v833_v21 }
  0x32   :  { %717 = vmatpush3.bf16.msra.mxu0 %v716_v6 }
  0x33   :  { %739 = vmatpush3.bf16.msra.mxu1 %v738_v8  ;;  %719 = vmatprep.subr.bf16.mxu0 %v718_v11 }
  0x34   :  { %740 = vmatprep.subr.bf16.mxu1 %v833_v21 }
  0x36   :  { %721 = vmatpush3.bf16.msra.mxu0 %v720_v15 }
  0x37   :  { %742 = vmatpush3.bf16.msra.mxu1 %v741_v17  ;;  %746 = vmatprep.subr.bf16.mxu0 %v833_v21 }
  0x38   :  { %743 = vmatprep.subr.bf16.mxu1 %v833_v21 }
  0x3b   :  { %745 = vmatpush3.bf16.msra.mxu1 %v744_v20 }
  0xed   :  { %v135_v30 = vpop.f32.mrb[0].mxu1 }
  0xee   :  { %v136_v31 = vadd.f32 %v135_v30, %v53_v27  ;;  %v137_v32 = vpop.f32.mrb[1].mxu1 }
  0xef   :  { %v138_v36 = vadd.f32 %v137_v32, %v57_v29 }
  0xf0   :  { %v210_v40 = vmax.f32 %v136_v31, 0.0 }
  0xf1   :  { %v206_v37 = vpop.f32.mrb[2].mxu1  ;;  %v211_v38 = vmax.f32 %v138_v36, 0.0 }
  0xf2   :  { %v207_v41 = vadd.f32 %v206_v37, %v61_v33  ;;  %v612_v42 = vpop.f32.mrb[3].mxu1 }
  0xf3   :  { %332 = vmatprep.mubr.f32.mxu0 %v211_v38 }
  0xf4   :  { %v212_v45 = vmax.f32 %v207_v41, 0.0  ;;  %333 = vmatmul.mubr.f32.vlgmr.msra.gmra.mrb[0].mxu0 %v210_v40 }
  0xf5   :  { %748 = vmatpush3.bf16.msra.mxu0 %v747_v39  ;;  %680 = vmatprep.mubr.msk.f32.mxu0 %vm834_vm1, %v832_v0  ;;  %v416_v0 = vld [vmem:[%s1012_s5 + $0x38] sm:$0xff]  ;;  %s521_s5 = sshll.u32 %s835_s4, 4  ;;  %s522_s5 = int_to_ptr.vmem [resolvable:$true] %s521_s5 }
  0xf6   :  { %646 = vmatmul.mubr.f32.vlgmr.msra.gmra.mrb[4].mxu1 %v212_v45  ;;  %749 = vmatprep.subr.bf16.mxu0 %v833_v21  ;;  %v756_v51 = vpack.c.bf16 %v416_v0, %v415_v50  ;;  %s803_s6 = scalar_lea.vmem %s522_s5, 128  ;;  %p808_p9 = scmp.lt.s32.totalorder %s522_s5, %s522_s5 }
  0xf7   :  { %p804_p8 = scmp.ne.s32.totalorder %s522_s5, %s803_s6  ;;  %p809_p10 = scmp.lt.s32.totalorder %s803_s6, %s803_s6 }
  0xf9   :  { %751 = vmatpush3.bf16.msra.mxu0 %v750_v46  ;;  %p810_p11 = por %p809_p10, %p808_p9 }
  0xfa   :  { %752 = vmatprep.subr.bf16.mxu0 %v833_v21 }
  0xfb   :  { %p811_p12 = pnand %p810_p11, %p804_p8 }
  0xfd   :  { %754 = vmatpush3.bf16.msra.mxu0 %v753_v49 }
  0xfe   :  { %755 = vmatprep.subr.bf16.mxu0 %v833_v21 }
 0x101   :  { %757 = vmatpush3.bf16.msra.mxu0 %v756_v51 }
 0x102   :  { %758 = vmatprep.subr.bf16.mxu0 %v833_v21 }
 0x105   :  { %760 = vmatpush3.bf16.msra.mxu0 %v759_v54 }
 0x106   :  { %761 = vmatprep.subr.bf16.mxu0 %v833_v21 }
 0x109   :  { %763 = vmatpush3.bf16.msra.mxu0 %v762_v57 }
 0x10a   :  { %764 = vmatprep.subr.bf16.mxu0 %v833_v21 }
 0x10d   :  { %766 = vmatpush3.bf16.msra.mxu0 %v765_v60 }
 0x10e   :  { %767 = vmatprep.subr.bf16.mxu0 %v833_v21 }
 0x111   :  { %769 = vmatpush3.bf16.msra.mxu0 %v768_v63 }
 0x1c7   :  { %v569_v1 = vpop.f32.mrb[0].mxu0 }
 0x1c8   :  { %v570_v2 = vpop.f32.mrb[1].mxu0 }
 0x1c9   :  { %v571_v4 = vadd.f32 %v570_v2, %v569_v1  ;;  %v404_v5 = vpop.f32.mrb[4].mxu1 }
 0x1ca   :  { %v647_v6 = vpop.f32.mrb[5].mxu1 }
 0x1cb   :  { %v335_v21 = vadd.f32 %v571_v4, %v532_v3 }
 0x1cd   :  { %v405_v7 = vadd.f32 %v404_v5, %v335_v21 }
 0x1cf   :  { %v408_v8 = vmax.f32 %v405_v7, 0.0 }
 0x1d1   :  { %681 = vmatmul.mubr.f32.vlgmr.msra.gmra.mrb[2].mxu0 %v408_v8 }
 0x2a4   :  { %v498_v10 = vpop.f32.mrb[2].mxu0 }
 0x2a5   :  { %v499_v11 = vadd.f32 %v533_v9, %v498_v10  ;;  %v682_v12 = vpop.f32.mrb[3].mxu0 }
 0x2a7   :  { %v503_v13 = vsel %vm502_vm2, %v499_v11, -inf }
 0x2a8   :  { %504 = vmax.xlane.f32.xlu0 %v503_v13 }
 0x335   :  { %v505_v14 = vpop.xlane.xlu0 %504 }
 0x336   :  { %v506_v15 = vsub.f32 %v499_v11, %v505_v14 }
 0x338   :  { %v507_v16 = vmul.f32 1.442695, %v506_v15 }
 0x33a   :  { %777 = vpow2.f32 %v507_v16 }
 0x344   :  { %v778_v17 = vpop.eup %777 }
 0x345   :  { %v509_v18 = vsel %vm502_vm2, %v778_v17, 0.0 }
 0x346   :  { %510 = vadd.xlane.f32.xlu0 %v509_v18 }
 0x3d3   :  { %v511_v19 = vpop.xlane.xlu0 %510 }
 0x3d4   :  { %779 = vrcp.f32 %v511_v19 }
 0x3de   :  { %v780_v20 = vpop.eup %779 }
 0x3df   :  { %v513_v22 = vmul.f32 %v780_v20, %v778_v17 }
 0x3e1   :  { %514 = vst.msk [vmem:[#allocation5] sm:$0xff] %vm502_vm2, %v513_v22 }
 0x3e2   :  { %814 = shalt.err (!%p811_p12)
}
 0x3e3   :  { %s815_s15 = scalar_lea.hbm %s1014_s7, 128 }
 0x3e4   :  { %p816_p13 = scmp.ne.s32.totalorder %s1014_s7, %s815_s15  ;;  %p819_p0 = scmp.lt.u32.totalorder %s815_s15, %s1014_s7 }
 0x3e6   :  { %p821_p1 = pnand %p819_p0, %p816_p13 }
 0x3e8   :  { %824 = shalt.err (!%p821_p1)
}
 0x3e9   :  { %524 = dma.vmem_to_hbm [thread:$0]  %s522_s5, 128, %s1014_s7, [#allocation4]  }
 0x3ea   :  { %827 = dma.done.wait [#allocation4], 128  }
 0x3eb   :  { %828 = vsyncadd [#allocation4], 4294967168 }
 0x3ec   :  { %528 = vsyncpa [#allocation3], 1 }
 0x3ed   :  { %529 = vsyncpa [#allocation4], 1 }

</bundles_post_ra>
